<compile_context>
chip_gen: v7x
topology: tpu7x:2x2x1
jax: 0.10.0
libtpu: 0.0.40
codegen_flags: <defaults>
</compile_context>

<pallas_src>
import functools
import math

import jax
import jax.numpy as jnp
import numpy as np
from jax.experimental import pallas as pl
from jax.experimental.pallas import tpu as pltpu


def _cross_attn_kernel(img_ref, rev_ref,
                       wq_ref, bq_ref,
                       wk_ref, bk_ref,
                       wv_ref, bv_ref,
                       wo_ref, bo_ref,
                       hmask_ref,
                       out_ref,
                       *, num_heads):
    f32 = jnp.float32
    H = num_heads

    img = img_ref[...].astype(f32)            # (Lq, Dq)
    rev = rev_ref[...].astype(f32)            # (Lkv, E)
    Lq = img.shape[0]
    Lkv, E = rev.shape

    # ---- Lane-dense in-projections: one MXU pass each, heads packed along E.
    # query_proj and the 1/sqrt(dh) scale are folded into wq/bq on the host.
    q = jnp.dot(img, wq_ref[...], preferred_element_type=f32) + bq_ref[...]   # (Lq, E)
    k = jnp.dot(rev, wk_ref[...], preferred_element_type=f32) + bk_ref[...]   # (Lkv, E)
    v = jnp.dot(rev, wv_ref[...], preferred_element_type=f32) + bv_ref[...]   # (Lkv, E)

    # ---- Attention core: per-head contractions realized by masking K/V with a
    # host-built (H, E) head-selector mask.  No in-kernel reshape/transpose of
    # the lane dim; dh=8-deep per-head math is not MXU-bound regardless.
    mask = hmask_ref[...]                                                     # (H, E)
    mask_b = jnp.broadcast_to(mask[:, None, :], (H, Lkv, E))
    k_m = jnp.broadcast_to(k[None], (H, Lkv, E)) * mask_b                     # (H, Lkv, E)
    v_m = jnp.broadcast_to(v[None], (H, Lkv, E)) * mask_b                     # (H, Lkv, E)
    q_b = jnp.broadcast_to(q[None], (H, Lq, E))                               # (H, Lq, E)

    s = jnp.einsum('hqe,hke->hqk', q_b, k_m,
                   preferred_element_type=f32)                                # (H, Lq, Lkv)
    s = s - jnp.max(s, axis=-1, keepdims=True)
    p = jnp.exp(s)
    p = p / jnp.sum(p, axis=-1, keepdims=True)        # exact divide (cheap here)

    o_h = jnp.einsum('hqk,hke->hqe', p, v_m,
                     preferred_element_type=f32)                              # (H, Lq, E)
    # Only head e//dh contributes at column e (v was masked), so the leading-
    # axis sum reproduces the concat-over-heads layout directly as (Lq, E).
    o = jnp.sum(o_h, axis=0)                                                  # (Lq, E)

    # ---- Out-projection: single lane-dense (Lq,E)@(E,E) matmul.
    out = jnp.dot(o, wo_ref[...], preferred_element_type=f32) + bo_ref[...]
    out_ref[...] = out.astype(out_ref.dtype)


def prepare_params(params, num_heads):
    """Host-side weight fusion & re-layout — zero kernel cost."""
    E = params["w_k"].shape[0]
    H = num_heads
    dh = E // H
    scale = 1.0 / math.sqrt(dh)

    # Fold query_proj into the Q in-projection, and fold the softmax scale.
    # (fp32 weights; if cast to bf16 for v6e/v7x, keep the scale separate.)
    w_qf = (params["w_q"] @ params["w_proj"]) * scale                  # (E, Dq)
    b_qf = (params["w_q"] @ params["b_proj"] + params["b_q"]) * scale  # (E,)

    wq = w_qf.T                           # (Dq, E) — lane-dense, heads along E
    bq = b_qf.reshape(1, E)
    wk = params["w_k"].T                  # (E, E)
    bk = params["b_k"].reshape(1, E)
    wv = params["w_v"].T                  # (E, E)
    bv = params["b_v"].reshape(1, E)
    wo = params["w_o"].T                  # (E, E)
    bo = params["b_o"].reshape(1, E)

    # (H, E) mask selecting each head's dh-wide slice of the embedding dim.
    head_mask = (jnp.arange(E)[None, :] // dh
                 == jnp.arange(H)[:, None]).astype(jnp.float32)
    return wq, bq, wk, bk, wv, bv, wo, bo, head_mask


def cross_attention(image_embedding, review_embeddings, params, num_heads):
    Lq, _ = image_embedding.shape
    Lkv, E = review_embeddings.shape
    assert E % num_heads == 0

    fused = prepare_params(params, num_heads)
    args = (image_embedding, review_embeddings) + tuple(fused)

    kernel = functools.partial(_cross_attn_kernel, num_heads=num_heads)

    vmem = pl.BlockSpec(memory_space=pltpu.MemorySpace.VMEM)
    # Single grid point: every operand fits comfortably in VMEM at these sizes.
    # (See module-level TODO(synk) for the production tiling/batching plan.)
    return pl.pallas_call(
        kernel,
        out_shape=jax.ShapeDtypeStruct((Lq, E), jnp.float32),
        in_specs=[vmem] * len(args),
        out_specs=vmem,
    )(*args)


def cross_attention_ref(image_embedding, review_embeddings, params, num_heads):
    """Pure-JAX reference mirroring torch semantics (fp32)."""
    E = review_embeddings.shape[-1]
    dh = E // num_heads
    query = image_embedding @ params["w_proj"].T + params["b_proj"]
    q = query @ params["w_q"].T + params["b_q"]
    k = review_embeddings @ params["w_k"].T + params["b_k"]
    v = review_embeddings @ params["w_v"].T + params["b_v"]
    Lq, Lkv = q.shape[0], k.shape[0]
    qh = q.reshape(Lq, num_heads, dh).transpose(1, 0, 2)
    kh = k.reshape(Lkv, num_heads, dh).transpose(1, 0, 2)
    vh = v.reshape(Lkv, num_heads, dh).transpose(1, 0, 2)
    s = jnp.einsum("hqd,hkd->hqk", qh, kh) / math.sqrt(dh)
    p = jax.nn.softmax(s, axis=-1)
    o = jnp.einsum("hqk,hkd->hqd", p, vh).transpose(1, 0, 2).reshape(Lq, E)
    return o @ params["w_o"].T + params["b_o"]


def init_params(key, query_dim, review_dim):
    ks = jax.random.split(key, 12)
    def u(k, shape, fan_in):
        bound = 1.0 / math.sqrt(fan_in)
        return jax.random.uniform(k, shape, jnp.float32, -bound, bound)
    return {
        "w_proj": u(ks[0], (review_dim, query_dim), query_dim),
        "b_proj": u(ks[1], (review_dim,), query_dim),
        "w_q":    u(ks[2], (review_dim, review_dim), review_dim),
        "w_k":    u(ks[3], (review_dim, review_dim), review_dim),
        "w_v":    u(ks[4], (review_dim, review_dim), review_dim),
        "b_q":    u(ks[5], (review_dim,), review_dim),
        "b_k":    u(ks[6], (review_dim,), review_dim),
        "b_v":    u(ks[7], (review_dim,), review_dim),
        "w_o":    u(ks[8], (review_dim, review_dim), review_dim),
        "b_o":    u(ks[9], (review_dim,), review_dim),
    }


if __name__ == "__main__":
    key = jax.random.PRNGKey(0)
    k_img, k_rev, k_par = jax.random.split(key, 3)

    L_q, query_dim = 8, 32
    L_kv, review_dim = 8, 64
    num_heads = 8

    image_embedding = jax.random.normal(k_img, (L_q, query_dim), jnp.float32)
    review_embeddings = jax.random.normal(k_rev, (L_kv, review_dim), jnp.float32)
    params = init_params(k_par, query_dim, review_dim)

    out = cross_attention(image_embedding, review_embeddings, params, num_heads)
    out = jax.block_until_ready(out)

    ref = cross_attention_ref(image_embedding, review_embeddings, params, num_heads)
    # All-fp32, exact softmax divide -> tighter tolerance than the previous
    # approx-reciprocal version (kept slightly loose for MXU pass-order noise).
    np.testing.assert_allclose(np.asarray(out), np.asarray(ref), rtol=1e-3, atol=1e-3)

    print("KERNEL_OK")
</pallas_src>

<mosaic_0001>
module attributes {stable_mosaic.version = 11 : i64} {
  func.func @_cross_attn_kernel(%arg0: memref<8x32xf32, #tpu.memory_space<vmem>>, %arg1: memref<8x64xf32, #tpu.memory_space<vmem>>, %arg2: memref<32x64xf32, #tpu.memory_space<vmem>>, %arg3: memref<1x64xf32, #tpu.memory_space<vmem>>, %arg4: memref<64x64xf32, #tpu.memory_space<vmem>>, %arg5: memref<1x64xf32, #tpu.memory_space<vmem>>, %arg6: memref<64x64xf32, #tpu.memory_space<vmem>>, %arg7: memref<1x64xf32, #tpu.memory_space<vmem>>, %arg8: memref<64x64xf32, #tpu.memory_space<vmem>>, %arg9: memref<1x64xf32, #tpu.memory_space<vmem>>, %arg10: memref<8x64xf32, #tpu.memory_space<vmem>>, %arg11: memref<8x64xf32, #tpu.memory_space<vmem>>) attributes {dimension_semantics = [], scalar_prefetch = 0 : i64, scratch_operands = 0 : i64, tpu.core_type = #tpu.core_type<tc>} {
    %c0 = arith.constant 0 : index
    %c0_0 = arith.constant 0 : index
    %0 = vector.load %arg0[%c0, %c0_0] : memref<8x32xf32, #tpu.memory_space<vmem>>, vector<8x32xf32>
    %c0_1 = arith.constant 0 : index
    %c0_2 = arith.constant 0 : index
    %1 = vector.load %arg1[%c0_1, %c0_2] : memref<8x64xf32, #tpu.memory_space<vmem>>, vector<8x64xf32>
    %c0_3 = arith.constant 0 : index
    %c0_4 = arith.constant 0 : index
    %2 = vector.load %arg2[%c0_3, %c0_4] : memref<32x64xf32, #tpu.memory_space<vmem>>, vector<32x64xf32>
    %cst = arith.constant dense<0.000000e+00> : vector<8x64xf32>
    %3 = tpu.matmul %0, %2, %cst {dimension_numbers = #tpu.dot_dimension_numbers<[1], [0], [0], [1], [0, 0, 1, 1], [], []>} : vector<8x32xf32>, vector<32x64xf32>, vector<8x64xf32> -> vector<8x64xf32>
    %c0_5 = arith.constant 0 : index
    %c0_6 = arith.constant 0 : index
    %4 = vector.load %arg3[%c0_5, %c0_6] : memref<1x64xf32, #tpu.memory_space<vmem>>, vector<1x64xf32>
    %5 = vector.broadcast %4 : vector<1x64xf32> to vector<8x64xf32>
    %6 = arith.addf %3, %5 : vector<8x64xf32>
    %c0_7 = arith.constant 0 : index
    %c0_8 = arith.constant 0 : index
    %7 = vector.load %arg4[%c0_7, %c0_8] : memref<64x64xf32, #tpu.memory_space<vmem>>, vector<64x64xf32>
    %cst_9 = arith.constant dense<0.000000e+00> : vector<8x64xf32>
    %8 = tpu.matmul %1, %7, %cst_9 {dimension_numbers = #tpu.dot_dimension_numbers<[1], [0], [0], [1], [0, 0, 1, 1], [], []>} : vector<8x64xf32>, vector<64x64xf32>, vector<8x64xf32> -> vector<8x64xf32>
    %c0_10 = arith.constant 0 : index
    %c0_11 = arith.constant 0 : index
    %9 = vector.load %arg5[%c0_10, %c0_11] : memref<1x64xf32, #tpu.memory_space<vmem>>, vector<1x64xf32>
    %10 = vector.broadcast %9 : vector<1x64xf32> to vector<8x64xf32>
    %11 = arith.addf %8, %10 : vector<8x64xf32>
    %c0_12 = arith.constant 0 : index
    %c0_13 = arith.constant 0 : index
    %12 = vector.load %arg6[%c0_12, %c0_13] : memref<64x64xf32, #tpu.memory_space<vmem>>, vector<64x64xf32>
    %cst_14 = arith.constant dense<0.000000e+00> : vector<8x64xf32>
    %13 = tpu.matmul %1, %12, %cst_14 {dimension_numbers = #tpu.dot_dimension_numbers<[1], [0], [0], [1], [0, 0, 1, 1], [], []>} : vector<8x64xf32>, vector<64x64xf32>, vector<8x64xf32> -> vector<8x64xf32>
    %c0_15 = arith.constant 0 : index
    %c0_16 = arith.constant 0 : index
    %14 = vector.load %arg7[%c0_15, %c0_16] : memref<1x64xf32, #tpu.memory_space<vmem>>, vector<1x64xf32>
    %15 = vector.broadcast %14 : vector<1x64xf32> to vector<8x64xf32>
    %16 = arith.addf %13, %15 : vector<8x64xf32>
    %c0_17 = arith.constant 0 : index
    %c0_18 = arith.constant 0 : index
    %17 = vector.load %arg10[%c0_17, %c0_18] : memref<8x64xf32, #tpu.memory_space<vmem>>, vector<8x64xf32>
    %18 = vector.shape_cast %17 : vector<8x64xf32> to vector<8x1x64xf32>
    %19 = vector.shape_cast %18 : vector<8x1x64xf32> to vector<8x1x64xf32>
    %20 = vector.broadcast %19 : vector<8x1x64xf32> to vector<8x8x64xf32>
    %21 = vector.shape_cast %11 : vector<8x64xf32> to vector<1x8x64xf32>
    %22 = vector.shape_cast %21 : vector<1x8x64xf32> to vector<1x8x64xf32>
    %23 = vector.broadcast %22 : vector<1x8x64xf32> to vector<8x8x64xf32>
    %24 = arith.mulf %23, %20 : vector<8x8x64xf32>
    %25 = vector.shape_cast %16 : vector<8x64xf32> to vector<1x8x64xf32>
    %26 = vector.shape_cast %25 : vector<1x8x64xf32> to vector<1x8x64xf32>
    %27 = vector.broadcast %26 : vector<1x8x64xf32> to vector<8x8x64xf32>
    %28 = arith.mulf %27, %20 : vector<8x8x64xf32>
    %29 = vector.shape_cast %6 : vector<8x64xf32> to vector<1x8x64xf32>
    %30 = vector.shape_cast %29 : vector<1x8x64xf32> to vector<1x8x64xf32>
    %31 = vector.broadcast %30 : vector<1x8x64xf32> to vector<8x8x64xf32>
    "tpu.trace_start"() <{level = 10 : i32, message = "hqe,hke->hqk"}> : () -> ()
    %cst_19 = arith.constant dense<0.000000e+00> : vector<8x8x8xf32>
    %32 = tpu.matmul %31, %24, %cst_19 {dimension_numbers = #tpu.dot_dimension_numbers<[2], [2], [1], [1], [0, 0, 0, 1, 1, 1], [0], [0]>} : vector<8x8x64xf32>, vector<8x8x64xf32>, vector<8x8x8xf32> -> vector<8x8x8xf32>
    "tpu.trace_stop"() : () -> ()
    %cst_20 = arith.constant dense<0xFF800000> : vector<8x8xf32>
    %33 = vector.multi_reduction <maximumf>, %32, %cst_20 [2] : vector<8x8x8xf32> to vector<8x8xf32>
    %34 = vector.shape_cast %33 : vector<8x8xf32> to vector<8x8x1xf32>
    %35 = vector.broadcast %34 : vector<8x8x1xf32> to vector<8x8x8xf32>
    %36 = arith.subf %32, %35 : vector<8x8x8xf32>
    %37 = math.exp %36 : vector<8x8x8xf32>
    %cst_21 = arith.constant dense<0.000000e+00> : vector<8x8xf32>
    %38 = vector.multi_reduction <add>, %37, %cst_21 [2] : vector<8x8x8xf32> to vector<8x8xf32>
    %39 = vector.shape_cast %38 : vector<8x8xf32> to vector<8x8x1xf32>
    %40 = vector.broadcast %39 : vector<8x8x1xf32> to vector<8x8x8xf32>
    %41 = arith.divf %37, %40 : vector<8x8x8xf32>
    "tpu.trace_start"() <{level = 10 : i32, message = "hqk,hke->hqe"}> : () -> ()
    %cst_22 = arith.constant dense<0.000000e+00> : vector<8x8x64xf32>
    %42 = tpu.matmul %41, %28, %cst_22 {dimension_numbers = #tpu.dot_dimension_numbers<[2], [1], [1], [2], [0, 0, 0, 1, 1, 2], [0], [0]>} : vector<8x8x8xf32>, vector<8x8x64xf32>, vector<8x8x64xf32> -> vector<8x8x64xf32>
    "tpu.trace_stop"() : () -> ()
    %cst_23 = arith.constant dense<0.000000e+00> : vector<8x64xf32>
    %43 = vector.multi_reduction <add>, %42, %cst_23 [0] : vector<8x8x64xf32> to vector<8x64xf32>
    %c0_24 = arith.constant 0 : index
    %c0_25 = arith.constant 0 : index
    %44 = vector.load %arg8[%c0_24, %c0_25] : memref<64x64xf32, #tpu.memory_space<vmem>>, vector<64x64xf32>
    %cst_26 = arith.constant dense<0.000000e+00> : vector<8x64xf32>
    %45 = tpu.matmul %43, %44, %cst_26 {dimension_numbers = #tpu.dot_dimension_numbers<[1], [0], [0], [1], [0, 0, 1, 1], [], []>} : vector<8x64xf32>, vector<64x64xf32>, vector<8x64xf32> -> vector<8x64xf32>
    %c0_27 = arith.constant 0 : index
    %c0_28 = arith.constant 0 : index
    %46 = vector.load %arg9[%c0_27, %c0_28] : memref<1x64xf32, #tpu.memory_space<vmem>>, vector<1x64xf32>
    %47 = vector.broadcast %46 : vector<1x64xf32> to vector<8x64xf32>
    %48 = arith.addf %45, %47 : vector<8x64xf32>
    %c0_29 = arith.constant 0 : index
    %c0_30 = arith.constant 0 : index
    %49 = vector.load %arg11[%c0_29, %c0_30] : memref<8x64xf32, #tpu.memory_space<vmem>>, vector<8x64xf32>
    tpu.vector_store %arg11[%c0_29, %c0_30], %48 {strides = array<i32>} : memref<8x64xf32, #tpu.memory_space<vmem>>, vector<8x64xf32>,
    return
  }
}

</mosaic_0001>

<bundles_post_ra>
// kernel: tpu_custom_call.1
= control target key start
LH: loop header
LB: loop body
LE: loop exit
PB: predicated region body
PF: predicated region fallthrough
CT: control target
= control target key end

     0   :  { %16 = vsyncpa [#allocation3], 0  ;;  %s2707_s0 = inlined_call_operand.hbm [shape: f32[8,32], index: 0, kind: input, shape index: {}]   ;;  %s2708_s1 = inlined_call_operand.hbm [shape: f32[8,64], index: 1, kind: input, shape index: {}]   ;;  %s2709_s2 = inlined_call_operand.hbm [shape: f32[32,64], index: 2, kind: input, shape index: {}]   ;;  %s2710_s3 = inlined_call_operand.vmem [shape: f32[1,64], index: 3, kind: input, shape index: {}]   ;;  %s2711_s4 = inlined_call_operand.hbm [shape: f32[64,64], index: 4, kind: input, shape index: {}]   ;;  %s2712_s5 = inlined_call_operand.vmem [shape: f32[1,64], index: 5, kind: input, shape index: {}]   ;;  %s2713_s6 = inlined_call_operand.hbm [shape: f32[64,64], index: 6, kind: input, shape index: {}]   ;;  %s2714_s7 = inlined_call_operand.vmem [shape: f32[1,64], index: 7, kind: input, shape index: {}]   ;;  %s2715_s8 = inlined_call_operand.hbm [shape: f32[64,64], index: 8, kind: input, shape index: {}]   ;;  %s2716_s9 = inlined_call_operand.vmem [shape: f32[1,64], index: 9, kind: input, shape index: {}]   ;;  %s2717_s10 = inlined_call_operand.vmem [shape: f32[8,64], index: 10, kind: input, shape index: {}]   ;;  %s2718_s11 = inlined_call_operand.hbm [shape: f32[8,64], index: 11, kind: output, shape index: {}]  }
   0x1   :  { %17 = vsyncpa [#allocation6], 0 }
   0x2   :  { %18 = vsyncpa [#allocation9], 0 }
   0x3   :  { %19 = vsyncpa [#allocation12], 0 }
   0x4   :  { %20 = vsyncpa [#allocation4], 0  ;;  %s2363_s17 = smov [#allocation5]   ;;  %s2199_s21 = scalar_lea.hbm %s2708_s1, 128 }
   0x5   :  { %s37_s18 = sshll.u32 %s2363_s17, 4  ;;  %p2200_p0 = scmp.ne.s32.totalorder %s2708_s1, %s2199_s21  ;;  %s38_s18 = int_to_ptr.vmem [resolvable:$true] %s37_s18 }
   0x6   :  { %p2203_p1 = scmp.lt.u32.totalorder %s2199_s21, %s2708_s1 }
   0x8   :  { %p2205_p2 = pnand %p2203_p1, %p2200_p0 }
   0xa   :  { %2208 = shalt.err (!%p2205_p2)
}
   0xb   :  { %s2209_s26 = scalar_lea.vmem %s38_s18, 128  ;;  %p2214_p4 = scmp.lt.s32.totalorder %s38_s18, %s38_s18 }
   0xc   :  { %p2210_p3 = scmp.ne.s32.totalorder %s38_s18, %s2209_s26  ;;  %p2215_p5 = scmp.lt.s32.totalorder %s2209_s26, %s2209_s26 }
   0xe   :  { %p2216_p6 = por %p2215_p5, %p2214_p4 }
  0x10   :  { %p2217_p7 = pnand %p2216_p6, %p2210_p3 }
  0x12   :  { %2220 = shalt.err (!%p2217_p7)
}
  0x13   :  { %40 = dma.hbm_to_vmem [thread:$0]  %s2708_s1, 128, %s38_s18, [#allocation6]  }
  0x14   :  { %s2364_s29 = smov [#allocation8]   ;;  %s2365_s12 = smov [#allocation2]  }
  0x15   :  { %s60_s30 = sshll.u32 %s2364_s29, 4  ;;  %s27_s13 = sshll.u32 %s2365_s12, 4  ;;  %s61_s30 = int_to_ptr.vmem [resolvable:$true] %s60_s30  ;;  %s28_s13 = int_to_ptr.vmem [resolvable:$true] %s27_s13 }
  0x16   :  { %s2221_s16 = scalar_lea.hbm %s2711_s4, 1024 }
  0x17   :  { %p2222_p8 = scmp.ne.s32.totalorder %s2711_s4, %s2221_s16  ;;  %p2225_p9 = scmp.lt.u32.totalorder %s2221_s16, %s2711_s4 }
  0x19   :  { %p2227_p10 = pnand %p2225_p9, %p2222_p8 }
  0x1b   :  { %2230 = shalt.err (!%p2227_p10)
}
  0x1c   :  { %s2231_s1 = scalar_lea.vmem %s61_s30, 1024  ;;  %p2236_p12 = scmp.lt.s32.totalorder %s61_s30, %s61_s30 }
  0x1d   :  { %p2232_p11 = scmp.ne.s32.totalorder %s61_s30, %s2231_s1  ;;  %p2237_p13 = scmp.lt.s32.totalorder %s2231_s1, %s2231_s1 }
  0x1f   :  { %p2238_p0 = por %p2237_p13, %p2236_p12 }
  0x21   :  { %p2239_p1 = pnand %p2238_p0, %p2232_p11 }
  0x23   :  { %2242 = shalt.err (!%p2239_p1)
}
  0x24   :  { %s2366_s18 = smov 128   ;;  %s2367_s22 = smov 8  }
  0x25   :  { %66 = dma.hbm_to_vmem [thread:$0]  %s2711_s4, 1024, %s61_s30, [#allocation9], %s2366_s18, %s2366_s18, %s2367_s22  }
  0x26   :  { %s2243_s27 = scalar_lea.hbm %s2707_s0, 128 }
  0x27   :  { %p2244_p2 = scmp.ne.s32.totalorder %s2707_s0, %s2243_s27  ;;  %p2247_p3 = scmp.lt.u32.totalorder %s2243_s27, %s2707_s0 }
  0x29   :  { %p2249_p4 = pnand %p2247_p3, %p2244_p2 }
  0x2b   :  { %2252 = shalt.err (!%p2249_p4)
}
  0x2c   :  { %s2253_s15 = scalar_lea.vmem %s28_s13, 128  ;;  %p2258_p6 = scmp.lt.s32.totalorder %s28_s13, %s28_s13 }
  0x2d   :  { %p2254_p5 = scmp.ne.s32.totalorder %s28_s13, %s2253_s15  ;;  %p2259_p7 = scmp.lt.s32.totalorder %s2253_s15, %s2253_s15 }
  0x2f   :  { %p2260_p8 = por %p2259_p7, %p2258_p6 }
  0x31   :  { %p2261_p9 = pnand %p2260_p8, %p2254_p5 }
  0x33   :  { %2264 = shalt.err (!%p2261_p9)
}
  0x34   :  { %30 = dma.hbm_to_vmem [thread:$0]  %s2707_s0, 128, %s28_s13, [#allocation3]  }
  0x35   :  { %s2368_s16 = smov [#allocation7]   ;;  %s2369_s19 = smov [#allocation10]  }
  0x36   :  { %s46_s17 = sshll.u32 %s2368_s16, 4  ;;  %s74_s20 = sshll.u32 %s2369_s19, 4  ;;  %s47_s17 = int_to_ptr.vmem [resolvable:$true] %s46_s17  ;;  %s75_s20 = int_to_ptr.vmem [resolvable:$true] %s74_s20 }
  0x37   :  { %s2265_s23 = scalar_lea.hbm %s2709_s2, 512 }
  0x38   :  { %p2266_p10 = scmp.ne.s32.totalorder %s2709_s2, %s2265_s23  ;;  %p2269_p11 = scmp.lt.u32.totalorder %s2265_s23, %s2709_s2 }
  0x3a   :  { %p2271_p12 = pnand %p2269_p11, %p2266_p10 }
  0x3c   :  { %2274 = shalt.err (!%p2271_p12)
}
  0x3d   :  { %s2275_s0 = scalar_lea.vmem %s47_s17, 512  ;;  %p2280_p0 = scmp.lt.s32.totalorder %s47_s17, %s47_s17 }
  0x3e   :  { %p2276_p13 = scmp.ne.s32.totalorder %s47_s17, %s2275_s0  ;;  %p2281_p1 = scmp.lt.s32.totalorder %s2275_s0, %s2275_s0 }
  0x40   :  { %p2282_p2 = por %p2281_p1, %p2280_p0 }
  0x42   :  { %p2283_p3 = pnand %p2282_p2, %p2276_p13 }
  0x44   :  { %2286 = shalt.err (!%p2283_p3)
}
  0x45   :  { %52 = dma.hbm_to_vmem [thread:$0]  %s2709_s2, 512, %s47_s17, [#allocation6], %s2366_s18, %s2366_s18, %s2367_s22  }
  0x46   :  { %s2287_s14 = scalar_lea.hbm %s2713_s6, 1024 }
  0x47   :  { %p2288_p4 = scmp.ne.s32.totalorder %s2713_s6, %s2287_s14  ;;  %p2291_p5 = scmp.lt.u32.totalorder %s2287_s14, %s2713_s6 }
  0x49   :  { %p2293_p6 = pnand %p2291_p5, %p2288_p4 }
  0x4b   :  { %2296 = shalt.err (!%p2293_p6)
}
  0x4c   :  { %s2297_s19 = scalar_lea.vmem %s75_s20, 1024  ;;  %p2302_p8 = scmp.lt.s32.totalorder %s75_s20, %s75_s20 }
  0x4d   :  { %p2298_p7 = scmp.ne.s32.totalorder %s75_s20, %s2297_s19  ;;  %p2303_p9 = scmp.lt.s32.totalorder %s2297_s19, %s2297_s19 }
  0x4f   :  { %p2304_p10 = por %p2303_p9, %p2302_p8 }
  0x51   :  { %p2305_p11 = pnand %p2304_p10, %p2298_p7 }
  0x53   :  { %2308 = shalt.err (!%p2305_p11)
}
  0x54   :  { %80 = dma.hbm_to_vmem [thread:$0]  %s2713_s6, 1024, %s75_s20, [#allocation9], %s2366_s18, %s2366_s18, %s2367_s22  }
  0x55   :  { %s2370_s21 = smov [#allocation11]   ;;  %s2309_s25 = scalar_lea.hbm %s2715_s8, 1024 }
  0x56   :  { %s88_s1 = sshll.u32 %s2370_s21, 4  ;;  %p2310_p12 = scmp.ne.s32.totalorder %s2715_s8, %s2309_s25  ;;  %s89_s1 = int_to_ptr.vmem [resolvable:$true] %s88_s1 }
  0x57   :  { %p2313_p13 = scmp.lt.u32.totalorder %s2309_s25, %s2715_s8 }
  0x59   :  { %p2315_p0 = pnand %p2313_p13, %p2310_p12 }
  0x5b   :  { %2318 = shalt.err (!%p2315_p0)
}
  0x5c   :  { %s2319_s28 = scalar_lea.vmem %s89_s1, 1024  ;;  %p2324_p2 = scmp.lt.s32.totalorder %s89_s1, %s89_s1 }
  0x5d   :  { %p2320_p1 = scmp.ne.s32.totalorder %s89_s1, %s2319_s28  ;;  %p2325_p3 = scmp.lt.s32.totalorder %s2319_s28, %s2319_s28 }
  0x5f   :  { %p2326_p4 = por %p2325_p3, %p2324_p2 }
  0x61   :  { %p2327_p5 = pnand %p2326_p4, %p2320_p1 }
  0x63   :  { %2330 = shalt.err (!%p2327_p5)
}
  0x64   :  { %94 = dma.hbm_to_vmem [thread:$0]  %s2715_s8, 1024, %s89_s1, [#allocation12], %s2366_s18, %s2366_s18, %s2367_s22  }
  0x65   :  { %2353 = dma.done.wait [#allocation3], 128  }
  0x66   :  { %2354 = vsyncadd [#allocation3], 4294967168 }
  0x67   :  { %2355 = dma.done.wait [#allocation6], 640  }
  0x68   :  { %2356 = vsyncadd [#allocation6], 4294966656 }
  0x69   :  { %2357 = dma.done.wait [#allocation9], 2048  }
  0x6a   :  { %2358 = vsyncadd [#allocation9], 4294965248 }
  0x6b   :  { %2359 = dma.done.wait [#allocation12], 1024  }
  0x6c   :  { %2360 = vsyncadd [#allocation12], 4294966272  ;;  %v2371_v0 = vmov 0.0|0.0   ;;  %vm2372_vm0 = vmmov 0   ;;  %v2373_v1 = vmov 0.0   ;;  %v119_v2 = vld [vmem:[#allocation7] sm:$0xff]  ;;  %v384_v36 = vlaneseq }
  0x6d   :  { %2111 = vmatprep.subr.bf16.mxu1 %v2371_v0  ;;  %1971 = vmatprep.mubr.msk.f32.mxu1 %vm2372_vm0, %v2373_v1  ;;  %v120_v3 = vld [vmem:[#allocation7 + $0x8] sm:$0xff]  ;;  %v121_v4 = vld [vmem:[#allocation7 + $0x10] sm:$0xff]  ;;  %v122_v6 = vld [vmem:[#allocation7 + $0x18] sm:$0xff]  ;;  %vm130_vm1 = vcmask 261120   ;;  %vm219_vm2 = vcmask 523264   ;;  %vm1072_vm3 = vcmask 64512  }
  0x6e   :  { %2129 = vmatprep.subr.bf16.mxu0 %v2371_v0  ;;  %2009 = vmatprep.mubr.msk.f32.mxu0 %vm2372_vm0, %v2373_v1  ;;  %v2112_v5 = vpack.c.bf16 %v120_v3, %v119_v2  ;;  %v2115_v7 = vpack.c.bf16 %v122_v6, %v121_v4  ;;  %v204_v8 = vld [vmem:[#allocation8] sm:$0xff]  ;;  %v205_v9 = vld [vmem:[#allocation8 + $0x8] sm:$0xff]  ;;  %v117_v10 = vld [vmem:[#allocation2] sm:$0xff]  ;;  %v2374_v34 = vmov 1966171168   ;;  %v385_v38 = vshrl.u32 %v384_v36, 7 }
  0x6f   :  { %v2118_v11 = vpack.c.bf16 %v205_v9, %v204_v8  ;;  %v206_v12 = vld [vmem:[#allocation8 + $0x10] sm:$0xff]  ;;  %v207_v13 = vld [vmem:[#allocation8 + $0x18] sm:$0xff]  ;;  %v208_v15 = vld [vmem:[#allocation8 + $0x20] sm:$0xff]  ;;  %v382_v35 = vunpack.c.l.s4 %v2374_v34  ;;  %s2375_s15 = smov [#allocation13]  }
  0x70   :  { %2113 = vmatpush3.bf16.msra.mxu1 %v2112_v5  ;;  %v2121_v14 = vpack.c.bf16 %v207_v13, %v206_v12  ;;  %v209_v16 = vld [vmem:[#allocation8 + $0x28] sm:$0xff]  ;;  %v210_v18 = vld [vmem:[#allocation8 + $0x30] sm:$0xff]  ;;  %v211_v19 = vld [vmem:[#allocation8 + $0x38] sm:$0xff]  ;;  %v431_v47 = vsub.s32 0, %v385_v38  ;;  %s1855_s4 = sshll.u32 %s2375_s15, 4  ;;  %s1856_s4 = int_to_ptr.vmem [resolvable:$true] %s1855_s4 }
  0x71   :  { %2114 = vmatprep.subr.bf16.mxu1 %v2371_v0  ;;  %v2124_v17 = vpack.c.bf16 %v209_v16, %v208_v15  ;;  %v2127_v20 = vpack.c.bf16 %v211_v19, %v210_v18  ;;  %v118_v21 = vld [vmem:[#allocation5] sm:$0xff]  ;;  %v293_v22 = vld [vmem:[#allocation10] sm:$0xff]  ;;  %v294_v23 = vld [vmem:[#allocation10 + $0x8] sm:$0xff]  ;;  %v383_v37 = vunpack.c.0.s8 %v382_v35  ;;  %s2331_s30 = scalar_lea.vmem %s1856_s4, 128  ;;  %p2336_p7 = scmp.lt.s32.totalorder %s1856_s4, %s1856_s4 }
  0x72   :  { %v2130_v24 = vpack.c.bf16 %v294_v23, %v293_v22  ;;  %v295_v25 = vld [vmem:[#allocation10 + $0x10] sm:$0xff]  ;;  %v296_v26 = vld [vmem:[#allocation10 + $0x18] sm:$0xff]  ;;  %v297_v27 = vld [vmem:[#allocation10 + $0x20] sm:$0xff]  ;;  %p2332_p6 = scmp.ne.s32.totalorder %s1856_s4, %s2331_s30  ;;  %p2337_p8 = scmp.lt.s32.totalorder %s2331_s30, %s2331_s30 }
  0x73   :  { %v2133_v28 = vpack.c.bf16 %v296_v26, %v295_v25  ;;  %v298_v29 = vld [vmem:[#allocation10 + $0x28] sm:$0xff]  ;;  %v299_v31 = vld [vmem:[#allocation10 + $0x30] sm:$0xff]  ;;  %v300_v32 = vld [vmem:[#allocation10 + $0x38] sm:$0xff]  ;;  %v386_v41 = vsub.s32 %v383_v37, %v385_v38 }
  0x74   :  { %2116 = vmatpush3.bf16.msra.mxu1 %v2115_v7  ;;  %2131 = vmatpush3.bf16.msra.mxu0 %v2130_v24  ;;  %v2136_v30 = vpack.c.bf16 %v298_v29, %v297_v27  ;;  %v2139_v33 = vpack.c.bf16 %v300_v32, %v299_v31  ;;  %v378_v42 = vld [vmem:[%s2717_s10] sm:$0xff]  ;;  %p2338_p9 = por %p2337_p8, %p2336_p7 }
  0x75   :  { %2117 = vmatprep.subr.bf16.mxu1 %v2371_v0  ;;  %2132 = vmatprep.subr.bf16.mxu0 %v2371_v0  ;;  %v387_v43 = vrot.slane %v378_v42, %v386_v41  ;;  %v380_v45 = vcombine.high %v378_v42, %v378_v42  ;;  %v1869_v50 = vld [vmem:[%s2712_s5] ss:$0 sm:$0xff] }
  0x76   :  { %v1867_v61 = vld [vmem:[%s2710_s3] ss:$0 sm:$0xff]  ;;  %p2339_p10 = pnand %p2338_p9, %p2332_p6 }
  0x77   :  { %1972 = vmatmul.mubr.msk.f32.vlgmr.msra.gmra.mrb[0].mxu1 %vm130_vm1, %v117_v10  ;;  %v403_v44 = vrot.slane %v387_v43, %v386_v41  ;;  %v395_v46 = vcombine.high %v387_v43, %v387_v43  ;;  %v394_v49 = vrot.slane %v380_v45, %v386_v41  ;;  %v1871_v19 = vld [vmem:[%s2714_s7] ss:$0 sm:$0xff] }
  0x78   :  { %2119 = vmatpush3.bf16.msra.mxu1 %v2118_v11  ;;  %1990 = vmatprep.mubr.msk.f32.mxu1 %vm2372_vm0, %v2373_v1 }
  0x79   :  { %2120 = vmatprep.subr.bf16.mxu1 %v2371_v0  ;;  %2134 = vmatpush3.bf16.msra.mxu0 %v2133_v28  ;;  %v425_v48 = vcombine.high %v403_v44, %v403_v44  ;;  %v417_v51 = vrot.slane %v395_v46, %v386_v41  ;;  %v410_v52 = vrot.slane %v394_v49, %v386_v41 }
  0x7a   :  { %2135 = vmatprep.subr.bf16.mxu0 %v2371_v0  ;;  %v432_v53 = vrot.slane %v403_v44, %v431_v47  ;;  %v396_v60 = vcombine.high %v394_v49, %v394_v49 }
  0x7b   :  { %v2550_v54 = vrot.slane %v425_v48, %v431_v47  ;;  %v427_v58 = vcombine.high %v417_v51, %v417_v51  ;;  %v426_v59 = vcombine.high %v410_v52, %v410_v52  ;;  %v436_v2 = vrot.slane %v417_v51, %v431_v47 }
  0x7c   :  { %2122 = vmatpush3.bf16.msra.mxu1 %v2121_v14  ;;  %v2556_v3 = vrot.slane %v410_v52, %v431_v47  ;;  %v424_v5 = vrot.slane %v396_v60, %v386_v41 }
  0x7d   :  { %2123 = vmatprep.subr.bf16.mxu1 %v2371_v0  ;;  %2137 = vmatpush3.bf16.msra.mxu0 %v2136_v30  ;;  %v2563_v8 = vrot.slane %v427_v58, %v431_v47  ;;  %v2565_v9 = vrot.slane %v426_v59, %v431_v47 }
  0x7e   :  { %2138 = vmatprep.subr.bf16.mxu0 %v2371_v0  ;;  %v428_v10 = vcombine.high %v424_v5, %v424_v5  ;;  %v2579_v13 = vrot.slane %v424_v5, %v431_v47 }
  0x80   :  { %2125 = vmatpush3.bf16.msra.mxu1 %v2124_v17  ;;  %v2591_v15 = vrot.slane %v428_v10, %v431_v47 }
  0x81   :  { %2126 = vmatprep.subr.bf16.mxu1 %v2371_v0  ;;  %2140 = vmatpush3.bf16.msra.mxu0 %v2139_v33 }
  0x82   :  { %2022 = vmatprep.subr.mxu0 %v2373_v1 }
  0x84   :  { %2128 = vmatpush3.bf16.msra.mxu1 %v2127_v20  ;;  %2010 = vmatmul.mubr.msk.f32.vlgmr.msra.gmra.mrb[0].mxu0 %vm219_vm2, %v118_v21 }
  0x85   :  { %2012 = vmatprep.subr.mxu1 %v2373_v1  ;;  %2024 = vmatprep.mubr.msk.f32.mxu0 %vm2372_vm0, %v2373_v1 }
  0x87   :  { %1991 = vmatmul.mubr.msk.f32.vlgmr.msra.gmra.mrb[2].mxu1 %vm219_vm2, %v118_v21 }
  0x88   :  { %2014 = vmatprep.mubr.msk.f32.mxu1 %vm2372_vm0, %v2373_v1 }
 0x14a   :  { %v200_v39 = vpop.f32.mrb[0].mxu1 }
 0x14b   :  { %v1973_v40 = vpop.f32.mrb[1].mxu1  ;;  %v201_v4 = vadd.f32 %v1867_v61, %v200_v39 }
 0x157   :  { %v374_v17 = vpop.f32.mrb[0].mxu0 }
 0x158   :  { %v2011_v18 = vpop.f32.mrb[1].mxu0  ;;  %v2614_v20 = vadd.f32 %v1871_v19, %v374_v17 }
 0x15a   :  { %v289_v55 = vpop.f32.mrb[2].mxu1  ;;  %v477_v21 = vmul.f32 %v432_v53, %v2614_v20  ;;  %v478_v22 = vmul.f32 %v436_v2, %v2614_v20 }
 0x15b   :  { %v290_v56 = vadd.f32 %v1869_v50, %v289_v55  ;;  %v1992_v57 = vpop.f32.mrb[3].mxu1 }
 0x15d   :  { %v469_v62 = vmul.f32 %v432_v53, %v290_v56  ;;  %v471_v63 = vmul.f32 %v2550_v54, %v290_v56  ;;  %v470_v6 = vmul.f32 %v436_v2, %v290_v56  ;;  %v473_v7 = vmul.f32 %v2556_v3, %v290_v56 }
 0x15e   :  { %v472_v11 = vmul.f32 %v2563_v8, %v290_v56  ;;  %v475_v12 = vmul.f32 %v2565_v9, %v290_v56  ;;  %v474_v14 = vmul.f32 %v2579_v13, %v290_v56  ;;  %v476_v16 = vmul.f32 %v2591_v15, %v290_v56 }
 0x15f   :  { %2013 = vmatpush3.xpose.msk.msra.mxu1 %vm219_vm2, %v469_v62  ;;  %2023 = vmatpush3.xpose.msk.msra.mxu0 %vm219_vm2, %v471_v63 }
 0x160   :  { %2017 = vmatprep.subr.mxu1 %v2373_v1  ;;  %2032 = vmatprep.subr.mxu0 %v2373_v1 }
 0x162   :  { %2015 = vmatmul.mubr.msk.f32.vlgmr.msra.gmra.mrb[4].mxu1 %vm219_vm2, %v201_v4  ;;  %2025 = vmatmul.mubr.msk.f32.vlgmr.msra.gmra.mrb[2].mxu0 %vm219_vm2, %v201_v4 }
 0x163   :  { %2018 = vmatpush3.xpose.msk.msra.mxu1 %vm219_vm2, %v470_v6  ;;  %2033 = vmatpush3.xpose.msk.msra.mxu0 %vm219_vm2, %v473_v7 }
 0x164   :  { %2019 = vmatprep.mubr.msk.f32.mxu1 %vm2372_vm0, %v2373_v1  ;;  %2034 = vmatprep.mubr.msk.f32.mxu0 %vm2372_vm0, %v2373_v1 }
 0x165   :  { %2027 = vmatprep.subr.mxu1 %v2373_v1  ;;  %2042 = vmatprep.subr.mxu0 %v2373_v1 }
 0x166   :  { %2020 = vmatmul.mubr.msk.f32.vlgmr.msra.gmra.mrb[6].mxu1 %vm219_vm2, %v201_v4  ;;  %2035 = vmatmul.mubr.msk.f32.vlgmr.msra.gmra.mrb[4].mxu0 %vm219_vm2, %v201_v4 }
 0x167   :  { %2028 = vmatpush3.xpose.msk.msra.mxu1 %vm219_vm2, %v472_v11  ;;  %2043 = vmatpush3.xpose.msk.msra.mxu0 %vm219_vm2, %v475_v12 }
 0x168   :  { %2029 = vmatprep.mubr.msk.f32.mxu1 %vm2372_vm0, %v2373_v1  ;;  %2044 = vmatprep.mubr.msk.f32.mxu0 %vm2372_vm0, %v2373_v1 }
 0x169   :  { %2037 = vmatprep.subr.mxu1 %v2373_v1  ;;  %2052 = vmatprep.subr.mxu0 %v2373_v1 }
 0x16a   :  { %2030 = vmatmul.mubr.msk.f32.vlgmr.msra.gmra.mrb[8].mxu1 %vm219_vm2, %v201_v4  ;;  %2045 = vmatmul.mubr.msk.f32.vlgmr.msra.gmra.mrb[6].mxu0 %vm219_vm2, %v201_v4 }
 0x16b   :  { %2038 = vmatpush3.xpose.msk.msra.mxu1 %vm219_vm2, %v474_v14  ;;  %2039 = vmatprep.mubr.msk.f32.mxu1 %vm2372_vm0, %v2373_v1 }
 0x16c   :  { %2047 = vmatprep.subr.mxu1 %v2373_v1  ;;  %2054 = vmatprep.mubr.msk.f32.mxu0 %vm2372_vm0, %v2373_v1 }
 0x16d   :  { %2053 = vmatpush3.msra.mxu0 %v477_v21 }
 0x16e   :  { %2040 = vmatmul.mubr.msk.f32.vlgmr.msra.gmra.mrb[10].mxu1 %vm219_vm2, %v201_v4  ;;  %2062 = vmatprep.subr.mxu0 %v2373_v1 }
 0x16f   :  { %2048 = vmatpush3.xpose.msk.msra.mxu1 %vm219_vm2, %v476_v16  ;;  %2049 = vmatprep.mubr.msk.f32.mxu1 %vm2372_vm0, %v2373_v1 }
 0x170   :  { %2057 = vmatprep.subr.mxu1 %v2373_v1 }
 0x172   :  { %2050 = vmatmul.mubr.msk.f32.vlgmr.msra.gmra.mrb[12].mxu1 %vm219_vm2, %v201_v4 }
 0x173   :  { %2059 = vmatprep.mubr.msk.f32.mxu1 %vm2372_vm0, %v2373_v1  ;;  %2058 = vmatpush3.msra.mxu1 %v478_v22 }
 0x174   :  { %2067 = vmatprep.subr.mxu1 %v2373_v1 }
 0x235   :  { %v557_v23 = vpop.f32.mrb[4].mxu1  ;;  %v703_v24 = vpop.f32.mrb[2].mxu0 }
 0x236   :  { %v2016_v25 = vpop.f32.mrb[5].mxu1  ;;  %v2026_v26 = vpop.f32.mrb[3].mxu0  ;;  %v1079_v27 = vsel %vm1072_vm3, %v703_v24, -inf  ;;  %v1073_v28 = vsel %vm1072_vm3, %v557_v23, -inf }
 0x237   :  { %1080 = vmax.xlane.f32.xlu1 %v1079_v27  ;;  %1074 = vmax.xlane.f32.xlu0 %v1073_v28 }
 0x239   :  { %v630_v29 = vpop.f32.mrb[6].mxu1  ;;  %v849_v30 = vpop.f32.mrb[4].mxu0 }
 0x23a   :  { %v2021_v31 = vpop.f32.mrb[7].mxu1  ;;  %v2036_v32 = vpop.f32.mrb[5].mxu0  ;;  %v1076_v33 = vsel %vm1072_vm3, %v630_v29, -inf  ;;  %v1085_v38 = vsel %vm1072_vm3, %v849_v30, -inf }
 0x23b   :  { %1077 = vmax.xlane.f32.xlu0 %v1076_v33 }
 0x23d   :  { %v776_v34 = vpop.f32.mrb[8].mxu1  ;;  %v995_v35 = vpop.f32.mrb[6].mxu0 }
 0x23e   :  { %v2031_v36 = vpop.f32.mrb[9].mxu1  ;;  %v2046_v37 = vpop.f32.mrb[7].mxu0  ;;  %v1082_v39 = vsel %vm1072_vm3, %v776_v34, -inf  ;;  %v1091_v42 = vsel %vm1072_vm3, %v995_v35, -inf }
 0x23f   :  { %1086 = vmax.xlane.f32.xlu0 %v1085_v38  ;;  %1083 = vmax.xlane.f32.xlu1 %v1082_v39 }
 0x241   :  { %v922_v40 = vpop.f32.mrb[10].mxu1 }
 0x242   :  { %v2041_v41 = vpop.f32.mrb[11].mxu1  ;;  %v1088_v43 = vsel %vm1072_vm3, %v922_v40, -inf }
 0x243   :  { %1092 = vmax.xlane.f32.xlu0 %v1091_v42  ;;  %1089 = vmax.xlane.f32.xlu1 %v1088_v43  ;;  %v479_v41 = vmul.f32 %v2550_v54, %v2614_v20  ;;  %v481_v54 = vmul.f32 %v2556_v3, %v2614_v20  ;;  %v483_v3 = vmul.f32 %v2565_v9, %v2614_v20 }
 0x244   :  { %v484_v9 = vmul.f32 %v2591_v15, %v2614_v20  ;;  %v1762_v15 = vld [vmem:[#allocation11 + $0x10] sm:$0xff] }
 0x245   :  { %v1068_v44 = vpop.f32.mrb[12].mxu1 }
 0x246   :  { %v2051_v45 = vpop.f32.mrb[13].mxu1  ;;  %v1094_v46 = vsel %vm1072_vm3, %v1068_v44, -inf }
 0x247   :  { %1095 = vmax.xlane.f32.xlu1 %v1094_v46 }
 0x2c4   :  { %v1081_v47 = vpop.xlane.xlu1 %1080  ;;  %v1075_v48 = vpop.xlane.xlu0 %1074 }
 0x2c5   :  { %v1099_v49 = vsub.f32 %v703_v24, %v1081_v47  ;;  %v1097_v50 = vsub.f32 %v557_v23, %v1075_v48  ;;  %v480_v47 = vmul.f32 %v2563_v8, %v2614_v20 }
 0x2c7   :  { %v1105_v51 = vmul.f32 1.442695, %v1097_v50  ;;  %v1109_v52 = vmul.f32 1.442695, %v1099_v49 }
 0x2c8   :  { %v1078_v53 = vpop.xlane.xlu0 %1077 }
 0x2c9   :  { %v1098_v55 = vsub.f32 %v630_v29, %v1078_v53  ;;  %2167 = vpow2.f32 %v1105_v51  ;;  %v482_v51 = vmul.f32 %v2579_v13, %v2614_v20  ;;  %v1763_v20 = vld [vmem:[#allocation11 + $0x18] sm:$0xff] }
 0x2ca   :  { %2169 = vpow2.f32 %v1109_v52 }
 0x2cb   :  { %v1107_v56 = vmul.f32 1.442695, %v1098_v55 }
 0x2cc   :  { %v1087_v57 = vpop.xlane.xlu0 %1086  ;;  %v1084_v58 = vpop.xlane.xlu1 %1083 }
 0x2cd   :  { %2171 = vpow2.f32 %v1107_v56  ;;  %v1101_v59 = vsub.f32 %v849_v30, %v1087_v57  ;;  %v1100_v60 = vsub.f32 %v776_v34, %v1084_v58  ;;  %v1760_v58 = vld [vmem:[#allocation11] sm:$0xff] }
 0x2cf   :  { %v1113_v61 = vmul.f32 1.442695, %v1101_v59  ;;  %v1111_v62 = vmul.f32 1.442695, %v1100_v60  ;;  %v1761_v59 = vld [vmem:[#allocation11 + $0x8] sm:$0xff] }
 0x2d0   :  { %v1093_v63 = vpop.xlane.xlu0 %1092  ;;  %v1090_v2 = vpop.xlane.xlu1 %1089  ;;  %v2142_v60 = vpack.c.bf16 %v1761_v59, %v1760_v58 }
 0x2d1   :  { %2173 = vpow2.f32 %v1113_v61  ;;  %v1103_v4 = vsub.f32 %v995_v35, %v1093_v63  ;;  %v1102_v5 = vsub.f32 %v922_v40, %v1090_v2  ;;  %v2145_v61 = vpack.c.bf16 %v1763_v20, %v1762_v15  ;;  %v1765_v63 = vld [vmem:[#allocation11 + $0x28] sm:$0xff] }
 0x2d2   :  { %2175 = vpow2.f32 %v1111_v62  ;;  %v1764_v62 = vld [vmem:[#allocation11 + $0x20] sm:$0xff] }
 0x2d3   :  { %v1117_v6 = vmul.f32 1.442695, %v1103_v4  ;;  %v1115_v7 = vmul.f32 1.442695, %v1102_v5  ;;  %v2168_v10 = vpop.eup %2167  ;;  %v2148_v2 = vpack.c.bf16 %v1765_v63, %v1764_v62  ;;  %v1767_v4 = vld [vmem:[#allocation11 + $0x38] sm:$0xff] }
 0x2d4   :  { %v1096_v11 = vpop.xlane.xlu1 %1095  ;;  %v1121_v14 = vsel %vm1072_vm3, %v2168_v10, 0.0  ;;  %v2170_v16 = vpop.eup %2169 }
 0x2d5   :  { %2177 = vpow2.f32 %v1117_v6  ;;  %v1104_v12 = vsub.f32 %v1068_v44, %v1096_v11  ;;  %1122 = vadd.xlane.f32.xlu0 %v1121_v14  ;;  %v1127_v21 = vsel %vm1072_vm3, %v2170_v16, 0.0 }
 0x2d6   :  { %2179 = vpow2.f32 %v1115_v7 }
 0x2d7   :  { %v2172_v17 = vpop.eup %2171  ;;  %v1119_v18 = vmul.f32 1.442695, %v1104_v12 }
 0x2d8   :  { %v1124_v19 = vsel %vm1072_vm3, %v2172_v17, 0.0 }
 0x2d9   :  { %2181 = vpow2.f32 %v1119_v18  ;;  %1125 = vadd.xlane.f32.xlu1 %v1124_v19  ;;  %1128 = vadd.xlane.f32.xlu0 %v1127_v21 }
 0x2db   :  { %v2174_v22 = vpop.eup %2173 }
 0x2dc   :  { %v2176_v23 = vpop.eup %2175  ;;  %v1133_v24 = vsel %vm1072_vm3, %v2174_v22, 0.0 }
 0x2dd   :  { %v1130_v25 = vsel %vm1072_vm3, %v2176_v23, 0.0  ;;  %1134 = vadd.xlane.f32.xlu0 %v1133_v24 }
 0x2de   :  { %1131 = vadd.xlane.f32.xlu1 %v1130_v25 }
 0x2df   :  { %v2178_v26 = vpop.eup %2177 }
 0x2e0   :  { %v2180_v27 = vpop.eup %2179  ;;  %v1139_v28 = vsel %vm1072_vm3, %v2178_v26, 0.0 }
 0x2e1   :  { %v1136_v29 = vsel %vm1072_vm3, %v2180_v27, 0.0  ;;  %1140 = vadd.xlane.f32.xlu0 %v1139_v28 }
 0x2e2   :  { %1137 = vadd.xlane.f32.xlu1 %v1136_v29 }
 0x2e3   :  { %v2635_v30 = vpop.eup %2181 }
 0x2e4   :  { %v1142_v31 = vsel %vm1072_vm3, %v2635_v30, 0.0 }
 0x2e6   :  { %1143 = vadd.xlane.f32.xlu1 %v1142_v31 }
 0x362   :  { %v1123_v32 = vpop.xlane.xlu0 %1122 }
 0x363   :  { %2183 = vrcp.f32 %v1123_v32 }
 0x366   :  { %v1126_v33 = vpop.xlane.xlu1 %1125  ;;  %v1129_v34 = vpop.xlane.xlu0 %1128 }
 0x367   :  { %2185 = vrcp.f32 %v1126_v33 }
 0x368   :  { %2187 = vrcp.f32 %v1129_v34 }
 0x36a   :  { %v1135_v35 = vpop.xlane.xlu0 %1134 }
 0x36b   :  { %v1132_v36 = vpop.xlane.xlu1 %1131  ;;  %2189 = vrcp.f32 %v1135_v35 }
 0x36c   :  { %2191 = vrcp.f32 %v1132_v36 }
 0x36d   :  { %v2184_v37 = vpop.eup %2183 }
 0x36e   :  { %v1146_v38 = vmul.f32 %v2184_v37, %v2168_v10  ;;  %v1141_v39 = vpop.xlane.xlu0 %1140 }
 0x36f   :  { %v1138_v40 = vpop.xlane.xlu1 %1137  ;;  %2193 = vrcp.f32 %v1141_v39 }
 0x370   :  { %2195 = vrcp.f32 %v1138_v40  ;;  %2055 = vmatmul.mubr.msk.f32.vlgmr.msra.gmra.mrb[8].mxu0 %vm1072_vm3, %v1146_v38 }
 0x371   :  { %v2186_v42 = vpop.eup %2185  ;;  %2063 = vmatpush3.msra.mxu0 %v479_v41  ;;  %2064 = vmatprep.mubr.msk.f32.mxu0 %vm2372_vm0, %v2373_v1  ;;  %v1897_v41 = vld [vmem:[%s2716_s9] ss:$0 sm:$0xff] }
 0x372   :  { %v2188_v43 = vpop.eup %2187  ;;  %v1148_v44 = vmul.f32 %v2186_v42, %v2172_v17  ;;  %2072 = vmatprep.subr.mxu0 %v2373_v1 }
 0x373   :  { %v1150_v45 = vmul.f32 %v2188_v43, %v2170_v16  ;;  %v1144_v46 = vpop.xlane.xlu1 %1143 }
 0x374   :  { %2197 = vrcp.f32 %v1144_v46  ;;  %2060 = vmatmul.mubr.msk.f32.vlgmr.msra.gmra.mrb[14].mxu1 %vm1072_vm3, %v1148_v44 }
 0x375   :  { %2065 = vmatmul.mubr.msk.f32.vlgmr.msra.gmra.mrb[10].mxu0 %vm1072_vm3, %v1150_v45  ;;  %2068 = vmatpush3.msra.mxu1 %v480_v47  ;;  %v2190_v48 = vpop.eup %2189 }
 0x376   :  { %2073 = vmatpush3.msra.mxu0 %v481_v54  ;;  %2069 = vmatprep.mubr.msk.f32.mxu1 %vm2372_vm0, %v2373_v1  ;;  %v2192_v49 = vpop.eup %2191  ;;  %v1154_v50 = vmul.f32 %v2190_v48, %v2174_v22 }
 0x377   :  { %2074 = vmatprep.mubr.msk.f32.mxu0 %vm2372_vm0, %v2373_v1  ;;  %2077 = vmatprep.subr.mxu1 %v2373_v1  ;;  %v1152_v8 = vmul.f32 %v2192_v49, %v2176_v23 }
 0x378   :  { %2082 = vmatprep.subr.mxu0 %v2373_v1 }
 0x379   :  { %2075 = vmatmul.mubr.msk.f32.vlgmr.msra.gmra.mrb[12].mxu0 %vm1072_vm3, %v1154_v50  ;;  %v2194_v52 = vpop.eup %2193  ;;  %2070 = vmatmul.mubr.msk.f32.vlgmr.msra.gmra.mrb[16].mxu1 %vm1072_vm3, %v1152_v8 }
 0x37a   :  { %2083 = vmatpush3.msra.mxu0 %v483_v3  ;;  %v2196_v53 = vpop.eup %2195  ;;  %v1158_v55 = vmul.f32 %v2194_v52, %v2178_v26  ;;  %2078 = vmatpush3.msra.mxu1 %v482_v51 }
 0x37b   :  { %2079 = vmatprep.mubr.msk.f32.mxu1 %vm2372_vm0, %v2373_v1  ;;  %v1156_v56 = vmul.f32 %v2196_v53, %v2180_v27  ;;  %2084 = vmatprep.mubr.msk.f32.mxu0 %vm2372_vm0, %v2373_v1 }
 0x37c   :  { %2087 = vmatprep.subr.mxu1 %v2373_v1  ;;  %2141 = vmatprep.subr.bf16.mxu0 %v2371_v0 }
 0x37d   :  { %2085 = vmatmul.mubr.msk.f32.vlgmr.msra.gmra.mrb[14].mxu0 %vm1072_vm3, %v1158_v55  ;;  %2080 = vmatmul.mubr.msk.f32.vlgmr.msra.gmra.mrb[18].mxu1 %vm1072_vm3, %v1156_v56 }
 0x37e   :  { %v2198_v13 = vpop.eup %2197  ;;  %2108 = vmatprep.mubr.msk.f32.mxu0 %vm2372_vm0, %v2373_v1  ;;  %2088 = vmatpush3.msra.mxu1 %v484_v9 }
 0x37f   :  { %v1160_v57 = vmul.f32 %v2198_v13, %v2635_v30  ;;  %2089 = vmatprep.mubr.msk.f32.mxu1 %vm2372_vm0, %v2373_v1  ;;  %2143 = vmatpush3.bf16.msra.mxu0 %v2142_v60  ;;  %v1766_v1 = vld [vmem:[#allocation11 + $0x30] sm:$0xff] }
 0x380   :  { %2144 = vmatprep.subr.bf16.mxu0 %v2371_v0  ;;  %v2151_v5 = vpack.c.bf16 %v1767_v4, %v1766_v1 }
 0x381   :  { %2090 = vmatmul.mubr.msk.f32.vlgmr.msra.gmra.mrb[20].mxu1 %vm1072_vm3, %v1160_v57 }
 0x383   :  { %2146 = vmatpush3.bf16.msra.mxu0 %v2145_v61 }
 0x384   :  { %2147 = vmatprep.subr.bf16.mxu0 %v2371_v0 }
 0x387   :  { %2149 = vmatpush3.bf16.msra.mxu0 %v2148_v2 }
 0x388   :  { %2150 = vmatprep.subr.bf16.mxu0 %v2371_v0 }
 0x38b   :  { %2152 = vmatpush3.bf16.msra.mxu0 %v2151_v5 }
 0x443   :  { %v1230_v6 = vpop.f32.mrb[8].mxu0 }
 0x444   :  { %v2056_v7 = vpop.f32.mrb[9].mxu0  ;;  %v1745_v11 = vsel %vm219_vm2, %v1230_v6, 0.0 }
 0x447   :  { %v1303_v10 = vpop.f32.mrb[14].mxu1 }
 0x448   :  { %v1746_v12 = vsel %vm219_vm2, %v1303_v10, 0.0  ;;  %v1376_v14 = vpop.f32.mrb[10].mxu0  ;;  %v2061_v16 = vpop.f32.mrb[15].mxu1 }
 0x449   :  { %v1747_v17 = vadd.f32 %v1746_v12, %v1745_v11  ;;  %v2066_v18 = vpop.f32.mrb[11].mxu0  ;;  %v1748_v19 = vsel %vm219_vm2, %v1376_v14, 0.0 }
 0x44b   :  { %v1749_v21 = vadd.f32 %v1748_v19, %v1747_v17 }
 0x44c   :  { %v1522_v22 = vpop.f32.mrb[12].mxu0  ;;  %v1449_v0 = vpop.f32.mrb[16].mxu1 }
 0x44d   :  { %v2076_v23 = vpop.f32.mrb[13].mxu0  ;;  %v1750_v24 = vsel %vm219_vm2, %v1449_v0, 0.0  ;;  %v2071_v25 = vpop.f32.mrb[17].mxu1  ;;  %v1752_v27 = vsel %vm219_vm2, %v1522_v22, 0.0 }
 0x44e   :  { %v1751_v26 = vadd.f32 %v1750_v24, %v1749_v21 }
 0x450   :  { %v1668_v28 = vpop.f32.mrb[14].mxu0  ;;  %v1753_v29 = vadd.f32 %v1752_v27, %v1751_v26  ;;  %v1595_v30 = vpop.f32.mrb[18].mxu1 }
 0x451   :  { %v2086_v31 = vpop.f32.mrb[15].mxu0  ;;  %v1754_v32 = vsel %vm219_vm2, %v1595_v30, 0.0  ;;  %v2081_v33 = vpop.f32.mrb[19].mxu1  ;;  %v1756_v35 = vsel %vm219_vm2, %v1668_v28, 0.0 }
 0x452   :  { %v1755_v34 = vadd.f32 %v1754_v32, %v1753_v29 }
 0x454   :  { %v1757_v36 = vadd.f32 %v1756_v35, %v1755_v34  ;;  %v1741_v37 = vpop.f32.mrb[20].mxu1 }
 0x455   :  { %v1758_v38 = vsel %vm219_vm2, %v1741_v37, 0.0  ;;  %v2091_v39 = vpop.f32.mrb[21].mxu1 }
 0x456   :  { %v1759_v40 = vadd.f32 %v1758_v38, %v1757_v36 }
 0x458   :  { %2109 = vmatmul.mubr.msk.f32.vlgmr.msra.gmra.mrb[16].mxu0 %vm219_vm2, %v1759_v40 }
 0x52b   :  { %v1844_v42 = vpop.f32.mrb[16].mxu0 }
 0x52c   :  { %v1845_v43 = vadd.f32 %v1897_v41, %v1844_v42  ;;  %v2110_v44 = vpop.f32.mrb[17].mxu0 }
 0x52e   :  { %1848 = vst.msk [vmem:[#allocation13] sm:$0xff] %vm219_vm2, %v1845_v43 }
 0x52f   :  { %2342 = shalt.err (!%p2339_p10)
}
 0x530   :  { %s2343_s2 = scalar_lea.hbm %s2718_s11, 128 }
 0x531   :  { %p2344_p11 = scmp.ne.s32.totalorder %s2718_s11, %s2343_s2  ;;  %p2347_p12 = scmp.lt.u32.totalorder %s2343_s2, %s2718_s11 }
 0x533   :  { %p2349_p13 = pnand %p2347_p12, %p2344_p11 }
 0x535   :  { %2352 = shalt.err (!%p2349_p13)
}
 0x536   :  { %1858 = dma.vmem_to_hbm [thread:$0]  %s1856_s4, 128, %s2718_s11, [#allocation4]  }
 0x537   :  { %2361 = dma.done.wait [#allocation4], 128  }
 0x538   :  { %2362 = vsyncadd [#allocation4], 4294967168 }
 0x539   :  { %1862 = vsyncpa [#allocation3], 1 }
 0x53a   :  { %1863 = vsyncpa [#allocation6], 1 }
 0x53b   :  { %1864 = vsyncpa [#allocation9], 1 }
 0x53c   :  { %1865 = vsyncpa [#allocation12], 1 }
 0x53d   :  { %1866 = vsyncpa [#allocation4], 1 }

</bundles_post_ra>
